<compile_context>
chip_gen: v6e
topology: v6e:2x2x1
jax: 0.10.0
libtpu: 0.0.40
codegen_flags: <defaults>
</compile_context>

<pallas_src>
import math
import jax
import jax.numpy as jnp
from jax.experimental import pallas as pl
from jax.experimental.pallas import tpu as pltpu  # noqa: F401  (TPU-specific tuning hooks)

# ----- static config -----
B = 2
C_IN = 4            # params['input_channels']
L = 16              # input sequence length
NUM_HEADS = 2       # params['num_multiheads']
HEAD_SIZE = 16      # params['singlehead_size']
MH_SIZE = 32        # params['multihead_size']
CNN_FILTERS = 32    # params['CNN_filters']
FILTER_SIZE = 5     # params['CNN_filtersize']
CNN_PAD = 2         # params['CNN_padding']
POOL = 2            # params['CNN_poolsize']
NUM_CLASSES = 2     # argSpace.numLabels
BN_EPS = 1e-5

L_PAD = L + 2 * CNN_PAD                       # 20
L_CONV = L_PAD - FILTER_SIZE + 1              # 16
L_POOL = L_CONV // POOL                       # 8
CK = C_IN * FILTER_SIZE                       # 20  (im2col width)
HS = NUM_HEADS * HEAD_SIZE                    # 32  (concat head width)
ROWS = B * L_POOL                             # 16  (post-pool rows, b-major)
CONV_ROWS = 2 * ROWS                          # 32  (pre-pool rows: even half / odd half)


# ---------------------------------------------------------------------------
# Fused kernel: conv(im2col)+BN+ReLU+maxpool -> fused QKV -> batched attention
# over all (head,batch) pairs -> MultiHeadLinear+ReLU -> seq-sum ->
# 'normalize' readout -> fc3.  Only logits and p_attn are written out.
# ---------------------------------------------------------------------------
def attention_net_kernel(xcol_ref, wcol_ref, wqkv_ref, wm_ref, wf_ref, bf_ref,
                         logits_ref, pattn_ref):
    # ---- Conv1d (bias-free) + folded BatchNorm + ReLU as one im2col matmul.
    # xcol: (CONV_ROWS, CK+1) with a trailing ones column; wcol: (CK+1, F+1)
    # holds the BN bias in its last row and an all-zero-weight / bias-1 output
    # column that yields a constant-1 feature (carries the QKV bias later).
    y = jnp.maximum(jnp.dot(xcol_ref[...], wcol_ref[...],
                            preferred_element_type=jnp.float32), 0.0)   # (32, F+1)

    # ---- MaxPool1d(2): im2col rows were ordered [even positions | odd positions]
    # so pooling is a single aligned sublane-half max (relu commutes with max).
    feat = jnp.maximum(y[:ROWS, :], y[ROWS:, :])                        # (16, F+1), last col == 1

    # ---- fused Q/K/V projection (+bias via the ones column): one matmul.
    # column layout: [Q_h0 | Q_h1 | K_h0 | K_h1 | V_h0 | V_h1]
    qkv = jnp.dot(feat, wqkv_ref[...], preferred_element_type=jnp.float32)  # (16, 3*HS)

    # ---- batched attention over all (head, batch) pairs: n = h*B + b -------
    def split_heads(x2d):  # (ROWS, H*S) -> (H*B, L_POOL, S); reshape is tile-aligned (free)
        return jnp.stack(
            [x2d[:, h * HEAD_SIZE:(h + 1) * HEAD_SIZE] for h in range(NUM_HEADS)],
            axis=0).reshape(NUM_HEADS * B, L_POOL, HEAD_SIZE)

    q = split_heads(qkv[:, 0:HS])
    k = split_heads(qkv[:, HS:2 * HS])
    v = split_heads(qkv[:, 2 * HS:3 * HS])

    scores = jnp.einsum('nqd,nkd->nqk', q, k,
                        preferred_element_type=jnp.float32) * (1.0 / math.sqrt(HEAD_SIZE))
    scores = scores - jnp.max(scores, axis=-1, keepdims=True)       # stable softmax
    e = jnp.exp(scores)
    p = e / jnp.sum(e, axis=-1, keepdims=True)                      # exact: p_attn is an output
    a = jnp.maximum(jnp.einsum('nqk,nkd->nqd', p, v,
                               preferred_element_type=jnp.float32), 0.0)   # (H*B, L_POOL, S)

    # ---- re-assemble (b,l) rows x [head0 | head1] lanes; the extra ones lane
    # carries the MultiHeadLinear bias.  Single lane-dense stores per output.
    ones_col = jnp.ones((L_POOL, 1), jnp.float32)
    attn_cat = jnp.concatenate(
        [jnp.concatenate([a[h * B + b] for h in range(NUM_HEADS)] + [ones_col], axis=1)
         for b in range(B)], axis=0)                                       # (16, HS+1)
    pattn_ref[...] = jnp.concatenate(
        [jnp.concatenate([p[h * B + b] for h in range(NUM_HEADS)], axis=1)
         for b in range(B)], axis=0)                                       # (16, H*L_POOL)

    # ---- MultiHeadLinear (+bias row) + ReLU, sum over seq, 'normalize', fc3 ----
    mh = jnp.maximum(jnp.dot(attn_cat, wm_ref[...],
                             preferred_element_type=jnp.float32), 0.0)     # (B*L_POOL, MH)
    ssum = jnp.concatenate(
        [jnp.sum(mh[b * L_POOL:(b + 1) * L_POOL, :], axis=0, keepdims=True)
         for b in range(B)], axis=0)                                       # (B, MH)

    n = B * MH_SIZE
    mean = jnp.sum(ssum, axis=(0, 1), keepdims=True) / n
    d = ssum - mean
    var = jnp.sum(d * d, axis=(0, 1), keepdims=True) / (n - 1)   # unbiased (torch.std)
    # NOTE: no eps guard -- matches PyTorch (inf/nan if all activations die).
    s_norm = d / jnp.sqrt(var)

    logits_ref[...] = (jnp.dot(s_norm, wf_ref[...], preferred_element_type=jnp.float32)
                       + bf_ref[...])


# ---------------------------------------------------------------------------
# One-time parameter packing (hoisted out of the per-call path): BN folding,
# im2col weight layout, fused QKV packing, bias rows / ones-producing column.
# ---------------------------------------------------------------------------
def pack_params(P):
    bn_scale = P['bn_gamma'] / jnp.sqrt(P['bn_var'] + BN_EPS)
    w_eff = (P['w_conv'] * bn_scale[:, None, None]).astype(jnp.float32)   # (F, C, K)
    b_eff = (P['bn_beta'] - P['bn_mean'] * bn_scale).astype(jnp.float32)  # (F,)

    # conv weights as a matmul with a bias row and an extra "ones" output column
    w_col = jnp.zeros((CK + 1, CNN_FILTERS + 1), jnp.float32)
    w_col = w_col.at[:CK, :CNN_FILTERS].set(w_eff.reshape(CNN_FILTERS, CK).T)
    w_col = w_col.at[CK, :CNN_FILTERS].set(b_eff)
    w_col = w_col.at[CK, CNN_FILTERS].set(1.0)        # relu(1) -> maxpool(1,1) -> ones lane

    # fused QKV weight (F+1, 3*H*S): cols [Q_h0 | Q_h1 | K_h0 | K_h1 | V_h0 | V_h1],
    # last row = biases (consumed by the ones lane of feat).
    def cols(w):  # (H, S, F) -> (F, H*S)
        return jnp.transpose(w, (2, 0, 1)).reshape(CNN_FILTERS, HS)

    w_qkv = jnp.concatenate([cols(P['wq']), cols(P['wk']), cols(P['wv'])], axis=1)
    b_qkv = jnp.concatenate([P['bq'].reshape(-1), P['bk'].reshape(-1),
                             P['bv'].reshape(-1)])[None, :]
    w_qkv = jnp.concatenate([w_qkv, b_qkv], axis=0)                       # (F+1, 3*HS)

    # MultiHeadLinear with its bias as an extra row (consumed by the appended ones lane)
    w_m = jnp.concatenate([P['wm'].T, P['bm'][None, :]], axis=0)          # (HS+1, MH)
    w_f = P['wf'].T                                                       # (MH, C)
    b_f = jnp.tile(P['bf'][None, :], (B, 1))                              # (B, C) pre-broadcast
    return {'w_col': w_col, 'w_qkv': w_qkv, 'w_m': w_m, 'w_f': w_f, 'b_f': b_f}


# ---------------------------------------------------------------------------
# Jitted forward: build the im2col activation (pool-friendly row order, ones
# column appended) and launch the single fused kernel.
# ---------------------------------------------------------------------------
@jax.jit
def attention_net_forward(x, packed):
    # im2col: row for conv position (b, l) is [xp[b,c,l+t] for c, t] (c-major, t-minor).
    # Rows are ordered [all even l | all odd l] (b-major within each half) so the
    # kernel's MaxPool1d(2) is just max(y[:ROWS], y[ROWS:]).
    xp = jnp.pad(x, ((0, 0), (0, 0), (CNN_PAD, CNN_PAD)))                 # (B, C, L_PAD)
    patches = jnp.stack([xp[:, :, t:t + L_CONV] for t in range(FILTER_SIZE)],
                        axis=-1)                                          # (B, C, LC, K)
    patches = jnp.transpose(patches, (0, 2, 1, 3)).reshape(B, L_CONV, CK)  # (B, LC, CK)
    x_col = jnp.concatenate(
        [patches[:, 0::2, :].reshape(ROWS, CK),
         patches[:, 1::2, :].reshape(ROWS, CK)], axis=0)                  # (CONV_ROWS, CK)
    x_col = jnp.concatenate([x_col, jnp.ones((CONV_ROWS, 1), jnp.float32)],
                            axis=1)                                       # (CONV_ROWS, CK+1)

    logits, pattn2d = pl.pallas_call(
        attention_net_kernel,
        out_shape=(
            jax.ShapeDtypeStruct((B, NUM_CLASSES), jnp.float32),
            jax.ShapeDtypeStruct((ROWS, NUM_HEADS * L_POOL), jnp.float32),
        ),
    )(x_col, packed['w_col'], packed['w_qkv'], packed['w_m'], packed['w_f'], packed['b_f'])
    return logits, pattn2d.reshape(B, L_POOL, NUM_HEADS * L_POOL)


# ---------------------------------------------------------------------------
# Pure-JAX reference (same math, same folded params) for a correctness check
# ---------------------------------------------------------------------------
def reference_forward(x, P):
    bn_scale = P['bn_gamma'] / jnp.sqrt(P['bn_var'] + BN_EPS)
    w_eff = P['w_conv'] * bn_scale[:, None, None]
    b_eff = P['bn_beta'] - P['bn_mean'] * bn_scale
    xp = jnp.pad(x, ((0, 0), (0, 0), (CNN_PAD, CNN_PAD)))
    y = jnp.zeros((B, CNN_FILTERS, L_CONV), jnp.float32)
    for t in range(FILTER_SIZE):
        y = y + jnp.einsum('fc,bcl->bfl', w_eff[:, :, t], xp[:, :, t:t + L_CONV])
    y = jnp.maximum(y + b_eff[None, :, None], 0.0)
    y = jnp.max(y.reshape(B, CNN_FILTERS, L_POOL, POOL), axis=-1)
    feat = jnp.transpose(y, (0, 2, 1))
    attns, pattns = [], []
    for h in range(NUM_HEADS):
        q = feat @ P['wq'][h].T + P['bq'][h]
        k = feat @ P['wk'][h].T + P['bk'][h]
        v = feat @ P['wv'][h].T + P['bv'][h]
        s = jnp.einsum('bqd,bkd->bqk', q, k) / math.sqrt(HEAD_SIZE)
        p = jax.nn.softmax(s, axis=-1)
        attns.append(jnp.maximum(jnp.einsum('bqk,bkd->bqd', p, v), 0.0))
        pattns.append(p)
    attn_cat = jnp.concatenate(attns, axis=2)
    pattn_cat = jnp.concatenate(pattns, axis=2)
    mh = jnp.maximum(attn_cat @ P['wm'].T + P['bm'], 0.0)
    s = mh.sum(axis=1)
    s = (s - s.mean()) / jnp.std(s, ddof=1)
    return s @ P['wf'].T + P['bf'], pattn_cat


# ---------------------------------------------------------------------------
# Deterministic parameter init (PyTorch-style uniform fan-in bounds)
# ---------------------------------------------------------------------------
def init_params(key):
    ks = jax.random.split(key, 16)

    def unif(k, shape, fan_in):
        bound = 1.0 / math.sqrt(fan_in)
        return jax.random.uniform(k, shape, jnp.float32, -bound, bound)

    return {
        'w_conv': unif(ks[0], (CNN_FILTERS, C_IN, FILTER_SIZE), C_IN * FILTER_SIZE),
        'bn_gamma': 1.0 + 0.1 * jax.random.normal(ks[1], (CNN_FILTERS,), jnp.float32),
        'bn_beta': 0.1 * jax.random.normal(ks[2], (CNN_FILTERS,), jnp.float32),
        'bn_mean': 0.1 * jax.random.normal(ks[3], (CNN_FILTERS,), jnp.float32),
        'bn_var': jnp.abs(1.0 + 0.1 * jax.random.normal(ks[4], (CNN_FILTERS,), jnp.float32)),
        'wq': unif(ks[5], (NUM_HEADS, HEAD_SIZE, CNN_FILTERS), CNN_FILTERS),
        'bq': unif(ks[6], (NUM_HEADS, HEAD_SIZE), CNN_FILTERS),
        'wk': unif(ks[7], (NUM_HEADS, HEAD_SIZE, CNN_FILTERS), CNN_FILTERS),
        'bk': unif(ks[8], (NUM_HEADS, HEAD_SIZE), CNN_FILTERS),
        'wv': unif(ks[9], (NUM_HEADS, HEAD_SIZE, CNN_FILTERS), CNN_FILTERS),
        'bv': unif(ks[10], (NUM_HEADS, HEAD_SIZE), CNN_FILTERS),
        'wm': unif(ks[11], (MH_SIZE, NUM_HEADS * HEAD_SIZE), NUM_HEADS * HEAD_SIZE),
        'bm': unif(ks[12], (MH_SIZE,), NUM_HEADS * HEAD_SIZE),
        'wf': unif(ks[13], (NUM_CLASSES, MH_SIZE), MH_SIZE),
        'bf': unif(ks[14], (NUM_CLASSES,), MH_SIZE),
    }


if __name__ == "__main__":
    key = jax.random.PRNGKey(0)
    k_param, k_x = jax.random.split(key)
    params = init_params(k_param)
    packed = pack_params(params)      # one-time weight packing (hoisted out of forward)
    # input: (batch, input_channels, length) = NCL, same as the PyTorch Conv1d input
    x = jax.random.normal(k_x, (B, C_IN, L), jnp.float32)

    logits, pattn = jax.block_until_ready(attention_net_forward(x, packed))
    ref_logits, ref_pattn = reference_forward(x, params)

    assert logits.shape == (B, NUM_CLASSES)
    assert pattn.shape == (B, L_POOL, NUM_HEADS * L_POOL)
    assert not bool(jnp.isnan(logits).any())
    # exact softmax division / exact sqrt -> tight tolerance (only MXU accumulation order)
    assert jnp.allclose(logits, ref_logits, rtol=1e-4, atol=1e-4)
    assert jnp.allclose(pattn, ref_pattn, rtol=1e-4, atol=1e-4)

    # TODO(synk): use_RNN=True branch (nn.LSTM), use_posEnc, training-mode dropout /
    # batch-stat BatchNorm are not implemented (config disables them).
    print("KERNEL_OK")
</pallas_src>

<mosaic_0001>
module attributes {stable_mosaic.version = 11 : i64} {
  func.func @attention_net_kernel(%arg0: memref<32x21xf32, #tpu.memory_space<vmem>>, %arg1: memref<21x33xf32, #tpu.memory_space<vmem>>, %arg2: memref<33x96xf32, #tpu.memory_space<vmem>>, %arg3: memref<33x32xf32, #tpu.memory_space<vmem>>, %arg4: memref<32x2xf32, #tpu.memory_space<vmem>>, %arg5: memref<2x2xf32, #tpu.memory_space<vmem>>, %arg6: memref<2x2xf32, #tpu.memory_space<vmem>>, %arg7: memref<16x16xf32, #tpu.memory_space<vmem>>) attributes {dimension_semantics = [], scalar_prefetch = 0 : i64, scratch_operands = 0 : i64, tpu.core_type = #tpu.core_type<tc>} {
    %c0 = arith.constant 0 : index
    %c0_0 = arith.constant 0 : index
    %0 = vector.load %arg0[%c0, %c0_0] : memref<32x21xf32, #tpu.memory_space<vmem>>, vector<32x21xf32>
    %c0_1 = arith.constant 0 : index
    %c0_2 = arith.constant 0 : index
    %1 = vector.load %arg1[%c0_1, %c0_2] : memref<21x33xf32, #tpu.memory_space<vmem>>, vector<21x33xf32>
    %cst = arith.constant dense<0.000000e+00> : vector<32x33xf32>
    %2 = tpu.matmul %0, %1, %cst {dimension_numbers = #tpu.dot_dimension_numbers<[1], [0], [0], [1], [0, 0, 1, 1], [], []>} : vector<32x21xf32>, vector<21x33xf32>, vector<32x33xf32> -> vector<32x33xf32>
    %cst_3 = arith.constant 0.000000e+00 : f32
    %3 = vector.broadcast %cst_3 : f32 to vector<32x33xf32>
    %4 = arith.maximumf %2, %3 : vector<32x33xf32>
    %5 = vector.extract_strided_slice %4 {offsets = [0, 0], sizes = [16, 33], strides = [1, 1]} : vector<32x33xf32> to vector<16x33xf32>
    %6 = vector.extract_strided_slice %4 {offsets = [16, 0], sizes = [16, 33], strides = [1, 1]} : vector<32x33xf32> to vector<16x33xf32>
    %7 = arith.maximumf %5, %6 : vector<16x33xf32>
    %c0_4 = arith.constant 0 : index
    %c0_5 = arith.constant 0 : index
    %8 = vector.load %arg2[%c0_4, %c0_5] : memref<33x96xf32, #tpu.memory_space<vmem>>, vector<33x96xf32>
    %cst_6 = arith.constant dense<0.000000e+00> : vector<16x96xf32>
    %9 = tpu.matmul %7, %8, %cst_6 {dimension_numbers = #tpu.dot_dimension_numbers<[1], [0], [0], [1], [0, 0, 1, 1], [], []>} : vector<16x33xf32>, vector<33x96xf32>, vector<16x96xf32> -> vector<16x96xf32>
    %10 = vector.extract_strided_slice %9 {offsets = [0, 0], sizes = [16, 32], strides = [1, 1]} : vector<16x96xf32> to vector<16x32xf32>
    %11 = vector.extract_strided_slice %10 {offsets = [0, 0], sizes = [16, 16], strides = [1, 1]} : vector<16x32xf32> to vector<16x16xf32>
    %12 = vector.extract_strided_slice %10 {offsets = [0, 16], sizes = [16, 16], strides = [1, 1]} : vector<16x32xf32> to vector<16x16xf32>
    %13 = vector.shape_cast %11 : vector<16x16xf32> to vector<1x16x16xf32>
    %14 = vector.shape_cast %12 : vector<16x16xf32> to vector<1x16x16xf32>
    %15 = tpu.concatenate %13, %14 in 0 : vector<1x16x16xf32>, vector<1x16x16xf32> -> vector<2x16x16xf32>
    %16 = vector.shape_cast %15 : vector<2x16x16xf32> to vector<4x8x16xf32>
    %17 = vector.extract_strided_slice %9 {offsets = [0, 32], sizes = [16, 32], strides = [1, 1]} : vector<16x96xf32> to vector<16x32xf32>
    %18 = vector.extract_strided_slice %17 {offsets = [0, 0], sizes = [16, 16], strides = [1, 1]} : vector<16x32xf32> to vector<16x16xf32>
    %19 = vector.extract_strided_slice %17 {offsets = [0, 16], sizes = [16, 16], strides = [1, 1]} : vector<16x32xf32> to vector<16x16xf32>
    %20 = vector.shape_cast %18 : vector<16x16xf32> to vector<1x16x16xf32>
    %21 = vector.shape_cast %19 : vector<16x16xf32> to vector<1x16x16xf32>
    %22 = tpu.concatenate %20, %21 in 0 : vector<1x16x16xf32>, vector<1x16x16xf32> -> vector<2x16x16xf32>
    %23 = vector.shape_cast %22 : vector<2x16x16xf32> to vector<4x8x16xf32>
    %24 = vector.extract_strided_slice %9 {offsets = [0, 64], sizes = [16, 32], strides = [1, 1]} : vector<16x96xf32> to vector<16x32xf32>
    %25 = vector.extract_strided_slice %24 {offsets = [0, 0], sizes = [16, 16], strides = [1, 1]} : vector<16x32xf32> to vector<16x16xf32>
    %26 = vector.extract_strided_slice %24 {offsets = [0, 16], sizes = [16, 16], strides = [1, 1]} : vector<16x32xf32> to vector<16x16xf32>
    %27 = vector.shape_cast %25 : vector<16x16xf32> to vector<1x16x16xf32>
    %28 = vector.shape_cast %26 : vector<16x16xf32> to vector<1x16x16xf32>
    %29 = tpu.concatenate %27, %28 in 0 : vector<1x16x16xf32>, vector<1x16x16xf32> -> vector<2x16x16xf32>
    %30 = vector.shape_cast %29 : vector<2x16x16xf32> to vector<4x8x16xf32>
    "tpu.trace_start"() <{level = 10 : i32, message = "nqd,nkd->nqk"}> : () -> ()
    %cst_7 = arith.constant dense<0.000000e+00> : vector<4x8x8xf32>
    %31 = tpu.matmul %16, %23, %cst_7 {dimension_numbers = #tpu.dot_dimension_numbers<[2], [2], [1], [1], [0, 0, 0, 1, 1, 1], [0], [0]>} : vector<4x8x16xf32>, vector<4x8x16xf32>, vector<4x8x8xf32> -> vector<4x8x8xf32>
    "tpu.trace_stop"() : () -> ()
    %cst_8 = arith.constant 2.500000e-01 : f32
    %32 = vector.broadcast %cst_8 : f32 to vector<4x8x8xf32>
    %33 = arith.mulf %31, %32 : vector<4x8x8xf32>
    %cst_9 = arith.constant dense<0xFF800000> : vector<4x8xf32>
    %34 = vector.multi_reduction <maximumf>, %33, %cst_9 [2] : vector<4x8x8xf32> to vector<4x8xf32>
    %35 = vector.shape_cast %34 : vector<4x8xf32> to vector<4x8x1xf32>
    %36 = vector.broadcast %35 : vector<4x8x1xf32> to vector<4x8x8xf32>
    %37 = arith.subf %33, %36 : vector<4x8x8xf32>
    %38 = math.exp %37 : vector<4x8x8xf32>
    %cst_10 = arith.constant dense<0.000000e+00> : vector<4x8xf32>
    %39 = vector.multi_reduction <add>, %38, %cst_10 [2] : vector<4x8x8xf32> to vector<4x8xf32>
    %40 = vector.shape_cast %39 : vector<4x8xf32> to vector<4x8x1xf32>
    %41 = vector.broadcast %40 : vector<4x8x1xf32> to vector<4x8x8xf32>
    %42 = arith.divf %38, %41 : vector<4x8x8xf32>
    "tpu.trace_start"() <{level = 10 : i32, message = "nqk,nkd->nqd"}> : () -> ()
    %cst_11 = arith.constant dense<0.000000e+00> : vector<4x8x16xf32>
    %43 = tpu.matmul %42, %30, %cst_11 {dimension_numbers = #tpu.dot_dimension_numbers<[2], [1], [1], [2], [0, 0, 0, 1, 1, 2], [0], [0]>} : vector<4x8x8xf32>, vector<4x8x16xf32>, vector<4x8x16xf32> -> vector<4x8x16xf32>
    "tpu.trace_stop"() : () -> ()
    %cst_12 = arith.constant 0.000000e+00 : f32
    %44 = vector.broadcast %cst_12 : f32 to vector<4x8x16xf32>
    %45 = arith.maximumf %43, %44 : vector<4x8x16xf32>
    %cst_13 = arith.constant 1.000000e+00 : f32
    %46 = vector.broadcast %cst_13 : f32 to vector<8x1xf32>
    %47 = vector.extract_strided_slice %45 {offsets = [0, 0, 0], sizes = [1, 8, 16], strides = [1, 1, 1]} : vector<4x8x16xf32> to vector<1x8x16xf32>
    %48 = vector.shape_cast %47 : vector<1x8x16xf32> to vector<8x16xf32>
    %49 = vector.extract_strided_slice %45 {offsets = [2, 0, 0], sizes = [1, 8, 16], strides = [1, 1, 1]} : vector<4x8x16xf32> to vector<1x8x16xf32>
    %50 = vector.shape_cast %49 : vector<1x8x16xf32> to vector<8x16xf32>
    %51 = tpu.concatenate %48, %50, %46 in 1 : vector<8x16xf32>, vector<8x16xf32>, vector<8x1xf32> -> vector<8x33xf32>
    %52 = vector.extract_strided_slice %45 {offsets = [1, 0, 0], sizes = [1, 8, 16], strides = [1, 1, 1]} : vector<4x8x16xf32> to vector<1x8x16xf32>
    %53 = vector.shape_cast %52 : vector<1x8x16xf32> to vector<8x16xf32>
    %54 = vector.extract_strided_slice %45 {offsets = [3, 0, 0], sizes = [1, 8, 16], strides = [1, 1, 1]} : vector<4x8x16xf32> to vector<1x8x16xf32>
    %55 = vector.shape_cast %54 : vector<1x8x16xf32> to vector<8x16xf32>
    %56 = tpu.concatenate %53, %55, %46 in 1 : vector<8x16xf32>, vector<8x16xf32>, vector<8x1xf32> -> vector<8x33xf32>
    %57 = tpu.concatenate %51, %56 in 0 : vector<8x33xf32>, vector<8x33xf32> -> vector<16x33xf32>
    %58 = vector.extract_strided_slice %42 {offsets = [0, 0, 0], sizes = [1, 8, 8], strides = [1, 1, 1]} : vector<4x8x8xf32> to vector<1x8x8xf32>
    %59 = vector.shape_cast %58 : vector<1x8x8xf32> to vector<8x8xf32>
    %60 = vector.extract_strided_slice %42 {offsets = [2, 0, 0], sizes = [1, 8, 8], strides = [1, 1, 1]} : vector<4x8x8xf32> to vector<1x8x8xf32>
    %61 = vector.shape_cast %60 : vector<1x8x8xf32> to vector<8x8xf32>
    %62 = tpu.concatenate %59, %61 in 1 : vector<8x8xf32>, vector<8x8xf32> -> vector<8x16xf32>
    %63 = vector.extract_strided_slice %42 {offsets = [1, 0, 0], sizes = [1, 8, 8], strides = [1, 1, 1]} : vector<4x8x8xf32> to vector<1x8x8xf32>
    %64 = vector.shape_cast %63 : vector<1x8x8xf32> to vector<8x8xf32>
    %65 = vector.extract_strided_slice %42 {offsets = [3, 0, 0], sizes = [1, 8, 8], strides = [1, 1, 1]} : vector<4x8x8xf32> to vector<1x8x8xf32>
    %66 = vector.shape_cast %65 : vector<1x8x8xf32> to vector<8x8xf32>
    %67 = tpu.concatenate %64, %66 in 1 : vector<8x8xf32>, vector<8x8xf32> -> vector<8x16xf32>
    %68 = tpu.concatenate %62, %67 in 0 : vector<8x16xf32>, vector<8x16xf32> -> vector<16x16xf32>
    %c0_14 = arith.constant 0 : index
    %c0_15 = arith.constant 0 : index
    %69 = vector.load %arg7[%c0_14, %c0_15] : memref<16x16xf32, #tpu.memory_space<vmem>>, vector<16x16xf32>
    tpu.vector_store %arg7[%c0_14, %c0_15], %68 {strides = array<i32>} : memref<16x16xf32, #tpu.memory_space<vmem>>, vector<16x16xf32>,
    %c0_16 = arith.constant 0 : index
    %c0_17 = arith.constant 0 : index
    %70 = vector.load %arg3[%c0_16, %c0_17] : memref<33x32xf32, #tpu.memory_space<vmem>>, vector<33x32xf32>
    %cst_18 = arith.constant dense<0.000000e+00> : vector<16x32xf32>
    %71 = tpu.matmul %57, %70, %cst_18 {dimension_numbers = #tpu.dot_dimension_numbers<[1], [0], [0], [1], [0, 0, 1, 1], [], []>} : vector<16x33xf32>, vector<33x32xf32>, vector<16x32xf32> -> vector<16x32xf32>
    %cst_19 = arith.constant 0.000000e+00 : f32
    %72 = vector.broadcast %cst_19 : f32 to vector<16x32xf32>
    %73 = arith.maximumf %71, %72 : vector<16x32xf32>
    %74 = vector.extract_strided_slice %73 {offsets = [0, 0], sizes = [8, 32], strides = [1, 1]} : vector<16x32xf32> to vector<8x32xf32>
    %cst_20 = arith.constant dense<0.000000e+00> : vector<32xf32>
    %75 = vector.multi_reduction <add>, %74, %cst_20 [0] : vector<8x32xf32> to vector<32xf32>
    %76 = vector.shape_cast %75 : vector<32xf32> to vector<1x32xf32>
    %77 = vector.extract_strided_slice %73 {offsets = [8, 0], sizes = [8, 32], strides = [1, 1]} : vector<16x32xf32> to vector<8x32xf32>
    %cst_21 = arith.constant dense<0.000000e+00> : vector<32xf32>
    %78 = vector.multi_reduction <add>, %77, %cst_21 [0] : vector<8x32xf32> to vector<32xf32>
    %79 = vector.shape_cast %78 : vector<32xf32> to vector<1x32xf32>
    %80 = tpu.concatenate %76, %79 in 0 : vector<1x32xf32>, vector<1x32xf32> -> vector<2x32xf32>
    %81 = vector.shape_cast %80 : vector<2x32xf32> to vector<1x2x32xf32>
    %cst_22 = arith.constant dense<0.000000e+00> : vector<1xf32>
    %82 = vector.multi_reduction <add>, %81, %cst_22 [1, 2] : vector<1x2x32xf32> to vector<1xf32>
    %83 = vector.shape_cast %82 : vector<1xf32> to vector<1x1x1xf32>
    %84 = vector.extract %83[0, 0, 0] : f32 from vector<1x1x1xf32>
    %85 = vector.broadcast %84 : f32 to vector<1x1xf32>
    %cst_23 = arith.constant 6.400000e+01 : f32
    %86 = vector.broadcast %cst_23 : f32 to vector<1x1xf32>
    %87 = arith.divf %85, %86 : vector<1x1xf32>
    %88 = vector.broadcast %87 : vector<1x1xf32> to vector<2x32xf32>
    %89 = arith.subf %80, %88 : vector<2x32xf32>
    %90 = arith.mulf %89, %89 : vector<2x32xf32>
    %91 = vector.shape_cast %90 : vector<2x32xf32> to vector<1x2x32xf32>
    %cst_24 = arith.constant dense<0.000000e+00> : vector<1xf32>
    %92 = vector.multi_reduction <add>, %91, %cst_24 [1, 2] : vector<1x2x32xf32> to vector<1xf32>
    %93 = vector.shape_cast %92 : vector<1xf32> to vector<1x1x1xf32>
    %94 = vector.extract %93[0, 0, 0] : f32 from vector<1x1x1xf32>
    %95 = vector.broadcast %94 : f32 to vector<1x1xf32>
    %cst_25 = arith.constant 6.300000e+01 : f32
    %96 = vector.broadcast %cst_25 : f32 to vector<1x1xf32>
    %97 = arith.divf %95, %96 : vector<1x1xf32>
    %98 = math.sqrt %97 : vector<1x1xf32>
    %99 = vector.broadcast %98 : vector<1x1xf32> to vector<2x32xf32>
    %100 = arith.divf %89, %99 : vector<2x32xf32>
    %c0_26 = arith.constant 0 : index
    %c0_27 = arith.constant 0 : index
    %101 = vector.load %arg4[%c0_26, %c0_27] : memref<32x2xf32, #tpu.memory_space<vmem>>, vector<32x2xf32>
    %cst_28 = arith.constant dense<0.000000e+00> : vector<2x2xf32>
    %102 = tpu.matmul %100, %101, %cst_28 {dimension_numbers = #tpu.dot_dimension_numbers<[1], [0], [0], [1], [0, 0, 1, 1], [], []>} : vector<2x32xf32>, vector<32x2xf32>, vector<2x2xf32> -> vector<2x2xf32>
    %c0_29 = arith.constant 0 : index
    %c0_30 = arith.constant 0 : index
    %103 = vector.load %arg5[%c0_29, %c0_30] : memref<2x2xf32, #tpu.memory_space<vmem>>, vector<2x2xf32>
    %104 = arith.addf %102, %103 : vector<2x2xf32>
    %c0_31 = arith.constant 0 : index
    %c0_32 = arith.constant 0 : index
    %105 = vector.load %arg6[%c0_31, %c0_32] : memref<2x2xf32, #tpu.memory_space<vmem>>, vector<2x2xf32>
    tpu.vector_store %arg6[%c0_31, %c0_32], %104 {strides = array<i32>} : memref<2x2xf32, #tpu.memory_space<vmem>>, vector<2x2xf32>,
    return
  }
}

</mosaic_0001>

<bundles_post_ra>
// kernel: attention_net_forward.1
= control target key start
LH: loop header
LB: loop body
LE: loop exit
PB: predicated region body
PF: predicated region fallthrough
CT: control target
= control target key end

     0   :  { %13 = vsyncpa [#allocation3], 0  ;;  %vm47_vm0 = vcmask 1044480   ;;  %vm34_vm1 = vcmask 171008   ;;  %s1643_s0 = inlined_call_operand.vmem [shape: f32[32,21], index: 0, kind: input, shape index: {}]   ;;  %s1644_s1 = inlined_call_operand.vmem [shape: f32[21,33], index: 1, kind: input, shape index: {}]   ;;  %s1645_s2 = inlined_call_operand.vmem [shape: f32[33,96], index: 2, kind: input, shape index: {}]   ;;  %s1646_s3 = inlined_call_operand.vmem [shape: f32[33,32], index: 3, kind: input, shape index: {}]   ;;  %s1647_s4 = inlined_call_operand.vmem [shape: f32[32,2], index: 4, kind: input, shape index: {}]   ;;  %s1648_s5 = inlined_call_operand.vmem [shape: f32[2,2], index: 5, kind: input, shape index: {}]   ;;  %s1649_s6 = inlined_call_operand.hbm [shape: f32[2,2], index: 6, kind: output, shape index: {0}]   ;;  %s1650_s7 = inlined_call_operand.hbm [shape: f32[16,16], index: 7, kind: output, shape index: {1}]  }
   0x1   :  { %v33_v0 = vld [vmem:[%s1644_s1 + $0x10] sm:$0x1f]  ;;  %v32_v1 = vld [vmem:[%s1644_s1 + $0x8] sm:$0xff]  ;;  %v27_v2 = vld [vmem:[%s1643_s0] sm:$0xff] }
   0x2   :  { %1244 = vmatprep.subr.msk.mxu0 %vm47_vm0, %v33_v0  ;;  %v31_v3 = vld [vmem:[%s1644_s1] sm:$0xff]  ;;  %1250 = vmatprep.mubr.msk.f32.mxu0 %vm34_vm1, %v27_v2 }
   0x3   :  { %1245 = vmatpush3.msk.msra.mxu0 %vm47_vm0, %v33_v0 }
   0x4   :  { %14 = vsyncpa [#allocation5], 0  ;;  %1246 = vmatprep.subr.mxu0 %v32_v1  ;;  %v28_v4 = vld [vmem:[%s1643_s0 + $0x8] sm:$0xff]  ;;  %v29_v5 = vld [vmem:[%s1643_s0 + $0x10] sm:$0xff]  ;;  %vm154_vm2 = vcmask 1040384   ;;  %vm147_vm3 = vcmask 269312  }
   0x5   :  { %1247 = vmatpush3.msra.mxu0 %v32_v1  ;;  %v30_v6 = vld [vmem:[%s1643_s0 + $0x18] sm:$0xff]  ;;  %v146_v7 = vld [vmem:[%s1645_s2 + $0x20] sm:$0x1]  ;;  %v144_v9 = vld [vmem:[%s1645_s2 + $0x10] sm:$0xff]  ;;  %v1411_v22 = vmov 0.0   ;;  %vm1412_vm4 = vmmov 0  }
   0x6   :  { %1248 = vmatprep.subr.mxu0 %v31_v3  ;;  %1256 = vmatprep.subr.msk.mxu1 %vm154_vm2, %v146_v7  ;;  %v145_v8 = vld [vmem:[%s1645_s2 + $0x18] sm:$0xff]  ;;  %v143_v10 = vld [vmem:[%s1645_s2 + $0x8] sm:$0xff]  ;;  %v142_v11 = vld [vmem:[%s1645_s2] sm:$0xff]  ;;  %s1413_s2 = smov 96   ;;  %s1414_s23 = smov 112   ;;  %vm241_vm5 = vcmask 130048  }
   0x7   :  { %1249 = vmatpush3.msra.mxu0 %v31_v3  ;;  %1257 = vmatpush3.msk.msra.mxu1 %vm154_vm2, %v146_v7  ;;  %vm548_vm6 = vcmask 64512   ;;  %s1415_s24 = smov 64   ;;  %s1416_s12 = smov 16   ;;  %vm906_vm7 = vcmask 261120   ;;  %vm1030_vm8 = vcmask 254976  }
   0x8   :  { %1251 = vmatmul.mubr.msk.f32.vlgmr.msra.gmra.mxu0 %vm34_vm1, %v28_v4  ;;  %1258 = vmatprep.subr.mxu1 %v145_v8 }
   0x9   :  { %1253 = vmatprep.mubr.msk.f32.mxu0 %vm34_vm1, %v29_v5  ;;  %1259 = vmatpush3.msra.mxu1 %v145_v8 }
   0xa   :  { %1260 = vmatprep.subr.mxu1 %v144_v9  ;;  %1269 = vmatprep.subr.mxu0 %v1411_v22 }
   0xb   :  { %1261 = vmatpush3.msra.mxu1 %v144_v9 }
   0xc   :  { %1254 = vmatmul.mubr.msk.f32.gmra.mxu0 %vm34_vm1, %v30_v6  ;;  %1262 = vmatprep.subr.mxu1 %v143_v10 }
   0xd   :  { %1263 = vmatpush3.msra.mxu1 %v143_v10  ;;  %1271 = vmatprep.mubr.msk.f32.mxu0 %vm1412_vm4, %v1411_v22 }
   0xe   :  { %1264 = vmatprep.subr.mxu1 %v142_v11 }
   0xf   :  { %1265 = vmatpush3.msra.mxu1 %v142_v11 }
  0x10   :  { %1274 = vmatprep.subr.mxu1 %v1411_v22 }
  0xc8   :  { %v1252_v12 = vpop.f32.mrf.mxu0 }
  0xc9   :  { %v137_v19 = vmax.f32 %v1252_v12, 0.0 }
  0xca   :  { %v117_v13 = vpop.f32.mrf.mxu0 }
  0xcb   :  { %v136_v17 = vmax.f32 %v117_v13, 0.0 }
  0xcc   :  { %v1255_v14 = vpop.f32.mrf.mxu0 }
  0xcd   :  { %v139_v15 = vmax.f32 %v1255_v14, 0.0 }
  0xce   :  { %v127_v16 = vpop.f32.mrf.mxu0 }
  0xcf   :  { %v138_v18 = vmax.f32 %v127_v16, 0.0  ;;  %v141_v21 = vmax.f32 %v137_v19, %v139_v15  ;;  %v928_v19 = vld [vmem:[%s1646_s3 + $0x20] sm:$0x1] }
  0xd1   :  { %v140_v20 = vmax.f32 %v136_v17, %v138_v18 }
  0xd3   :  { %1266 = vmatprep.mubr.msk.f32.mxu1 %vm147_vm3, %v140_v20  ;;  %v927_v20 = vld [vmem:[%s1646_s3 + $0x18] sm:$0xff] }
  0xd4   :  { %1267 = vmatmul.mubr.msk.f32.vlgmr.msra.gmra.mxu1 %vm147_vm3, %v141_v21 }
  0xd5   :  { %1276 = vmatprep.mubr.msk.f32.mxu1 %vm1412_vm4, %v1411_v22 }
 0x194   :  { %v1511_v23 = vpop.f32.mrf.mxu1 }
 0x196   :  { %v224_v24 = vpop.f32.mrf.mxu1 }
 0x197   :  { %239 = vrot.lane.b32.xlu1 %v224_v24, %s1413_s2  ;;  %235 = vrot.lane.b32.xlu0 %v224_v24, %s1414_s23 }
 0x19b   :  { %316 = vrot.lane.b32.xlu1 %v1511_v23, %s1413_s2  ;;  %237 = vrot.lane.b32.xlu0 %v1511_v23, %s1414_s23 }
 0x209   :  { %v240_v25 = vpop.permute.xlu1 %239  ;;  %v236_v26 = vpop.permute.xlu0 %235 }
 0x20a   :  { %1270 = vmatpush3.xpose.msk.msra.mxu0 %vm241_vm5, %v240_v25  ;;  %392 = vrot.lane.b32.xlu0 %v236_v26, %s1413_s2  ;;  %v925_v25 = vld [vmem:[%s1646_s3 + $0x8] sm:$0xff] }
 0x20b   :  { %1279 = vmatprep.subr.mxu0 %v1411_v22 }
 0x20d   :  { %1272 = vmatmul.mubr.msk.f32.vlgmr.msra.gmra.mxu0 %vm241_vm5, %v224_v24  ;;  %v317_v27 = vpop.permute.xlu1 %316  ;;  %v1518_v28 = vpop.permute.xlu0 %237 }
 0x20e   :  { %1275 = vmatpush3.xpose.msk.msra.mxu1 %vm241_vm5, %v317_v27  ;;  %468 = vrot.lane.b32.xlu1 %v1518_v28, %s1413_s2  ;;  %v924_v27 = vld [vmem:[%s1646_s3] sm:$0xff] }
 0x20f   :  { %1281 = vmatprep.mubr.msk.f32.mxu0 %vm1412_vm4, %v1411_v22  ;;  %1284 = vmatprep.subr.mxu1 %v1411_v22 }
 0x211   :  { %1277 = vmatmul.mubr.msk.f32.vlgmr.msra.gmra.mxu1 %vm241_vm5, %v1511_v23 }
 0x212   :  { %1286 = vmatprep.mubr.msk.f32.mxu1 %vm1412_vm4, %v1411_v22 }
 0x27c   :  { %v393_v29 = vpop.permute.xlu0 %392 }
 0x27d   :  { %1280 = vmatpush3.xpose.msk.msra.mxu0 %vm241_vm5, %v393_v29 }
 0x27e   :  { %1289 = vmatprep.subr.mxu0 %v1411_v22 }
 0x280   :  { %v469_v30 = vpop.permute.xlu1 %468  ;;  %1282 = vmatmul.mubr.msk.f32.vlgmr.msra.gmra.mxu0 %vm241_vm5, %v236_v26 }
 0x281   :  { %1285 = vmatpush3.xpose.msk.msra.mxu1 %vm241_vm5, %v469_v30  ;;  %1291 = vmatprep.mubr.msk.f32.mxu0 %vm1412_vm4, %v1411_v22 }
 0x282   :  { %1294 = vmatprep.subr.mxu1 %v1411_v22 }
 0x284   :  { %1287 = vmatmul.mubr.msk.f32.vlgmr.msra.gmra.mxu1 %vm241_vm5, %v1518_v28 }
 0x285   :  { %1296 = vmatprep.mubr.msk.f32.mxu1 %vm1412_vm4, %v1411_v22 }
 0x2cd   :  { %v312_v31 = vpop.f32.mrf.mxu0 }
 0x2ce   :  { %v544_v32 = vmul.f32 0.25, %v312_v31 }
 0x2cf   :  { %v1273_v33 = vpop.f32.mrf.mxu0 }
 0x2d0   :  { %v549_v34 = vsel %vm548_vm6, %v544_v32, -inf }
 0x2d1   :  { %v388_v35 = vpop.f32.mrf.mxu1  ;;  %550 = vmax.xlane.f32.xlu0 %v549_v34 }
 0x2d2   :  { %v545_v36 = vmul.f32 0.25, %v388_v35 }
 0x2d3   :  { %v1278_v37 = vpop.f32.mrf.mxu1 }
 0x2d4   :  { %v552_v38 = vsel %vm548_vm6, %v545_v36, -inf }
 0x2d5   :  { %553 = vmax.xlane.f32.xlu1 %v552_v38 }
 0x2e6   :  { %593 = vrot.lane.b32.xlu1 %v224_v24, %s1415_s24  ;;  %v926_v24 = vld [vmem:[%s1646_s3 + $0x10] sm:$0xff]  ;;  %s1417_s3 = smov 8  }
 0x340   :  { %v464_v39 = vpop.f32.mrf.mxu0 }
 0x341   :  { %v546_v40 = vmul.f32 0.25, %v464_v39 }
 0x342   :  { %v1283_v41 = vpop.f32.mrf.mxu0 }
 0x343   :  { %v555_v42 = vsel %vm548_vm6, %v546_v40, -inf }
 0x344   :  { %v540_v43 = vpop.f32.mrf.mxu1  ;;  %556 = vmax.xlane.f32.xlu0 %v555_v42 }
 0x345   :  { %v547_v44 = vmul.f32 0.25, %v540_v43 }
 0x346   :  { %v1288_v45 = vpop.f32.mrf.mxu1 }
 0x347   :  { %v558_v46 = vsel %vm548_vm6, %v547_v44, -inf }
 0x348   :  { %559 = vmax.xlane.f32.xlu0 %v558_v46 }
 0x35a   :  { %v551_v47 = vpop.xlane.xlu0 %550 }
 0x35b   :  { %v561_v48 = vsub.f32 %v544_v32, %v551_v47 }
 0x35d   :  { %v565_v49 = vmul.f32 1.442695, %v561_v48 }
 0x35e   :  { %v554_v50 = vpop.xlane.xlu1 %553 }
 0x35f   :  { %1347 = vpow2.f32 %v565_v49  ;;  %v562_v51 = vsub.f32 %v545_v36, %v554_v50 }
 0x361   :  { %v567_v52 = vmul.f32 1.442695, %v562_v51 }
 0x362   :  { %v594_v53 = vpop.permute.xlu1 %593 }
 0x363   :  { %1349 = vpow2.f32 %v567_v52  ;;  %1290 = vmatpush3.msra.mxu0 %v594_v53 }
 0x364   :  { %1299 = vmatprep.subr.mxu0 %v1411_v22 }
 0x36c   :  { %v1348_v54 = vpop.eup %1347 }
 0x36d   :  { %v573_v55 = vsel %vm548_vm6, %v1348_v54, 0.0 }
 0x36e   :  { %574 = vadd.xlane.f32.xlu1 %v573_v55 }
 0x370   :  { %v1350_v56 = vpop.eup %1349 }
 0x371   :  { %v576_v57 = vsel %vm548_vm6, %v1350_v56, 0.0 }
 0x372   :  { %577 = vadd.xlane.f32.xlu0 %v576_v57 }
 0x37f   :  { %745 = vrot.lane.b32.xlu1 %v236_v26, %s1415_s24 }
 0x3cd   :  { %v557_v58 = vpop.xlane.xlu0 %556 }
 0x3ce   :  { %v563_v59 = vsub.f32 %v546_v40, %v557_v58 }
 0x3d0   :  { %v569_v60 = vmul.f32 1.442695, %v563_v59 }
 0x3d1   :  { %v560_v61 = vpop.xlane.xlu0 %559 }
 0x3d2   :  { %1351 = vpow2.f32 %v569_v60  ;;  %v564_v62 = vsub.f32 %v547_v44, %v560_v61 }
 0x3d4   :  { %v571_v63 = vmul.f32 1.442695, %v564_v62 }
 0x3d6   :  { %1353 = vpow2.f32 %v571_v63 }
 0x3df   :  { %v1352_v0 = vpop.eup %1351 }
 0x3e0   :  { %v579_v1 = vsel %vm548_vm6, %v1352_v0, 0.0 }
 0x3e1   :  { %580 = vadd.xlane.f32.xlu1 %v579_v1 }
 0x3e3   :  { %v1354_v2 = vpop.eup %1353 }
 0x3e4   :  { %v582_v3 = vsel %vm548_vm6, %v1354_v2, 0.0 }
 0x3e5   :  { %583 = vadd.xlane.f32.xlu0 %v582_v3 }
 0x3f2   :  { %821 = vrot.lane.b32.xlu1 %v1518_v28, %s1415_s24 }
 0x3f7   :  { %v575_v4 = vpop.xlane.xlu1 %574 }
 0x3f8   :  { %1355 = vrcp.f32 %v575_v4 }
 0x3fb   :  { %669 = vrot.lane.b32.xlu0 %v1511_v23, %s1415_s24  ;;  %v746_v7 = vpop.permute.xlu1 %745  ;;  %v578_v8 = vpop.xlane.xlu0 %577 }
 0x3fc   :  { %1357 = vrcp.f32 %v578_v8 }
 0x405   :  { %v1356_v5 = vpop.eup %1355 }
 0x406   :  { %v1555_v6 = vmul.f32 %v1356_v5, %v1348_v54 }
 0x408   :  { %1292 = vmatmul.mubr.msk.f32.vlgmr.msra.gmra.mxu0 %vm548_vm6, %v1555_v6 }
 0x409   :  { %1300 = vmatpush3.msra.mxu0 %v746_v7  ;;  %1301 = vmatprep.mubr.msk.f32.mxu0 %vm1412_vm4, %v1411_v22  ;;  %v1358_v11 = vpop.eup %1357 }
 0x40a   :  { %v1561_v13 = vmul.f32 %v1358_v11, %v1350_v56  ;;  %1309 = vmatprep.subr.msk.mxu0 %vm154_vm2, %v928_v19 }
 0x46a   :  { %v581_v9 = vpop.xlane.xlu1 %580 }
 0x46b   :  { %1359 = vrcp.f32 %v581_v9 }
 0x46e   :  { %v584_v10 = vpop.xlane.xlu0 %583  ;;  %v822_v14 = vpop.permute.xlu1 %821 }
 0x46f   :  { %1361 = vrcp.f32 %v584_v10 }
 0x472   :  { %v670_v12 = vpop.permute.xlu0 %669 }
 0x473   :  { %1295 = vmatpush3.msra.mxu1 %v670_v12 }
 0x474   :  { %1297 = vmatmul.mubr.msk.f32.vlgmr.msra.gmra.mxu1 %vm548_vm6, %v1561_v13  ;;  %1304 = vmatprep.subr.mxu1 %v1411_v22 }
 0x475   :  { %1305 = vmatpush3.msra.mxu1 %v822_v14  ;;  %1306 = vmatprep.mubr.msk.f32.mxu1 %vm1412_vm4, %v1411_v22 }
 0x476   :  { %1322 = vmatprep.subr.mxu1 %v1411_v22 }
 0x478   :  { %v1360_v15 = vpop.eup %1359 }
 0x479   :  { %v1569_v16 = vmul.f32 %v1360_v15, %v1352_v0  ;;  %v1070_v15 = vld [vmem:[%s1647_s4 + $0x10] sm:$0xff] }
 0x47b   :  { %1302 = vmatmul.mubr.msk.f32.vlgmr.msra.gmra.mxu0 %vm548_vm6, %v1569_v16 }
 0x47c   :  { %v1362_v17 = vpop.eup %1361  ;;  %1310 = vmatpush3.msk.msra.mxu0 %vm154_vm2, %v928_v19 }
 0x47d   :  { %v1573_v18 = vmul.f32 %v1362_v17, %v1354_v2  ;;  %1311 = vmatprep.subr.mxu0 %v927_v20  ;;  %v1068_v17 = vld [vmem:[%s1647_s4] sm:$0xff] }
 0x47e   :  { %1312 = vmatpush3.msra.mxu0 %v927_v20 }
 0x47f   :  { %1307 = vmatmul.mubr.msk.f32.vlgmr.msra.gmra.mxu1 %vm548_vm6, %v1573_v18  ;;  %1313 = vmatprep.subr.mxu0 %v926_v24 }
 0x480   :  { %1330 = vmatprep.mubr.msk.f32.mxu1 %vm1412_vm4, %v1411_v22  ;;  %1314 = vmatpush3.msra.mxu0 %v926_v24 }
 0x481   :  { %1315 = vmatprep.subr.mxu0 %v925_v25 }
 0x482   :  { %1316 = vmatpush3.msra.mxu0 %v925_v25 }
 0x483   :  { %1317 = vmatprep.subr.mxu0 %v924_v27 }
 0x484   :  { %1318 = vmatpush3.msra.mxu0 %v924_v27 }
 0x4c8   :  { %v665_v21 = vpop.f32.mrf.mxu0 }
 0x4c9   :  { %v897_v35 = vmax.f32 %v665_v21, 0.0 }
 0x4ca   :  { %v1293_v23 = vpop.f32.mrf.mxu0 }
 0x534   :  { %v741_v26 = vpop.f32.mrf.mxu1 }
 0x535   :  { %v898_v39 = vmax.f32 %v741_v26, 0.0 }
 0x536   :  { %v1298_v28 = vpop.f32.mrf.mxu1 }
 0x53b   :  { %v817_v29 = vpop.f32.mrf.mxu0 }
 0x53c   :  { %v899_v30 = vmax.f32 %v817_v29, 0.0 }
 0x53d   :  { %v1303_v31 = vpop.f32.mrf.mxu0 }
 0x53e   :  { %902 = vrot.lane.b32.xlu0 %v899_v30, %s1416_s12 }
 0x53f   :  { %v893_v32 = vpop.f32.mrf.mxu1 }
 0x540   :  { %v900_v33 = vmax.f32 %v893_v32, 0.0 }
 0x541   :  { %v1308_v34 = vpop.f32.mrf.mxu1 }
 0x542   :  { %909 = vrot.lane.b32.xlu1 %v900_v33, %s1416_s12 }
 0x5b0   :  { %v903_v36 = vpop.permute.xlu0 %902 }
 0x5b1   :  { %v905_v37 = vsel %vm241_vm5, %v897_v35, %v903_v36 }
 0x5b2   :  { %v907_v38 = vsel %vm906_vm7, %v905_v37, 1.0 }
 0x5b3   :  { %1319 = vmatprep.mubr.msk.f32.mxu0 %vm147_vm3, %v907_v38 }
 0x5b4   :  { %v910_v40 = vpop.permute.xlu1 %909 }
 0x5b5   :  { %v912_v41 = vsel %vm241_vm5, %v898_v39, %v910_v40 }
 0x5b6   :  { %v913_v42 = vsel %vm906_vm7, %v912_v41, 1.0 }
 0x5b7   :  { %1320 = vmatmul.mubr.msk.f32.vlgmr.msra.gmra.mxu0 %vm147_vm3, %v913_v42 }
 0x677   :  { %v1321_v43 = vpop.f32.mrf.mxu0 }
 0x678   :  { %v1014_v44 = vmax.f32 %v1321_v43, 0.0 }
 0x679   :  { %v1004_v45 = vpop.f32.mrf.mxu0 }
 0x67a   :  { %v1022_v46 = vsel %vm906_vm7, %v1014_v44, 0.0  ;;  %v1013_v47 = vmax.f32 %v1004_v45, 0.0 }
 0x67b   :  { %v1023_v48 = vrot.slane %v1022_v46, 4 }
 0x67c   :  { %v1015_v49 = vsel %vm906_vm7, %v1013_v47, 0.0 }
 0x67d   :  { %v1024_v50 = vadd.f32 %v1023_v48, %v1022_v46  ;;  %v1016_v51 = vrot.slane %v1015_v49, 4 }
 0x67f   :  { %v1025_v52 = vrot.slane %v1024_v50, 2  ;;  %v1017_v53 = vadd.f32 %v1016_v51, %v1015_v49 }
 0x681   :  { %v1026_v54 = vadd.f32 %v1025_v52, %v1024_v50  ;;  %v1018_v55 = vrot.slane %v1017_v53, 2 }
 0x683   :  { %v1027_v56 = vrot.slane %v1026_v54, 1  ;;  %v1019_v57 = vadd.f32 %v1018_v55, %v1017_v53 }
 0x685   :  { %v1020_v58 = vrot.slane %v1019_v57, 1  ;;  %v1028_v60 = vadd.f32 %v1027_v56, %v1026_v54 }
 0x687   :  { %v1021_v59 = vadd.f32 %v1020_v58, %v1019_v57 }
 0x689   :  { %v1029_v61 = vsel %vm154_vm2, %v1021_v59, %v1028_v60 }
 0x68a   :  { %v1031_v62 = vsel %vm1030_vm8, %v1029_v61, 0.0 }
 0x68b   :  { %1032 = vadd.xlane.f32.xlu0 %v1031_v62 }
 0x6a1   :  { %914 = vrot.lane.b32.xlu0 %v1569_v16, %s1417_s3  ;;  %v1069_v16 = vld [vmem:[%s1647_s4 + $0x8] sm:$0xff] }
 0x714   :  { %v1033_v63 = vpop.xlane.xlu0 %1032 }
 0x715   :  { %v1034_v0 = vrot.slane %v1033_v63, 4 }
 0x717   :  { %v1035_v1 = vadd.f32 %v1034_v0, %v1033_v63 }
 0x718   :  { %v915_v2 = vpop.permute.xlu0 %914 }
 0x719   :  { %v1036_v3 = vrot.slane %v1035_v1, 2  ;;  %v917_v4 = vsel %vm548_vm6, %v1555_v6, %v915_v2  ;;  %v1071_v6 = vld [vmem:[%s1647_s4 + $0x18] sm:$0xff]  ;;  %s1418_s4 = smov [#allocation4]  }
 0x71a   :  { %922 = vst.msk [vmem:[#allocation4] sm:$0xff] %vm241_vm5, %v917_v4  ;;  %1323 = vmatpush3.msra.mxu1 %v1071_v6  ;;  %s1163_s21 = sshll.u32 %s1418_s4, 4  ;;  %s1164_s21 = int_to_ptr.vmem [resolvable:$true] %s1163_s21 }
 0x71b   :  { %v1037_v5 = vadd.f32 %v1036_v3, %v1035_v1  ;;  %1324 = vmatprep.subr.mxu1 %v1411_v22  ;;  %s1367_s22 = scalar_lea.vmem %s1164_s21, 256  ;;  %p1372_p1 = scmp.lt.s32.totalorder %s1164_s21, %s1164_s21 }
 0x71c   :  { %1325 = vmatpush3.msra.mxu1 %v1070_v15  ;;  %p1368_p0 = scmp.ne.s32.totalorder %s1164_s21, %s1367_s22  ;;  %p1373_p2 = scmp.lt.s32.totalorder %s1367_s22, %s1367_s22 }
 0x71d   :  { %v1038_v7 = vrot.slane %v1037_v5, 1  ;;  %1326 = vmatprep.subr.mxu1 %v1411_v22 }
 0x71e   :  { %1327 = vmatpush3.msra.mxu1 %v1069_v16  ;;  %p1374_p3 = por %p1373_p2, %p1372_p1 }
 0x71f   :  { %v1039_v8 = vadd.f32 %v1038_v7, %v1037_v5  ;;  %1328 = vmatprep.subr.mxu1 %v1411_v22 }
 0x720   :  { %1329 = vmatpush3.msra.mxu1 %v1068_v17  ;;  %p1375_p4 = pnand %p1374_p3, %p1368_p0 }
 0x721   :  { %1333 = vpush %v1039_v8 }
 0x752   :  { %s1334_s1 = spop %1333 }
 0x753   :  { %v1041_v9 = vstv %s1334_s1 }
 0x754   :  { %v1043_v10 = vmul.f32 0.015625, %v1041_v9 }
 0x756   :  { %v1044_v11 = vsub.f32 %v1029_v61, %v1043_v10 }
 0x758   :  { %v1045_v12 = vmul.f32 %v1044_v11, %v1044_v11 }
 0x75a   :  { %v1046_v14 = vsel %vm1030_vm8, %v1045_v12, 0.0 }
 0x75b   :  { %1047 = vadd.xlane.f32.xlu1 %v1046_v14 }
 0x76c   :  { %918 = vrot.lane.b32.xlu1 %v1573_v18, %s1417_s3 }
 0x7e4   :  { %v1048_v18 = vpop.xlane.xlu1 %1047 }
 0x7e5   :  { %v1049_v19 = vrot.slane %v1048_v18, 4 }
 0x7e7   :  { %v1050_v20 = vadd.f32 %v1049_v19, %v1048_v18 }
 0x7e8   :  { %v919_v21 = vpop.permute.xlu1 %918 }
 0x7e9   :  { %v1051_v23 = vrot.slane %v1050_v20, 2  ;;  %v921_v24 = vsel %vm548_vm6, %v1561_v13, %v919_v21 }
 0x7ea   :  { %923 = vst.msk [vmem:[#allocation4 + $0x8] sm:$0xff] %vm241_vm5, %v921_v24 }
 0x7eb   :  { %v1052_v25 = vadd.f32 %v1051_v23, %v1050_v20 }
 0x7ed   :  { %v1053_v26 = vrot.slane %v1052_v25, 1 }
 0x7ef   :  { %v1054_v27 = vadd.f32 %v1053_v26, %v1052_v25 }
 0x7f1   :  { %1335 = vpush %v1054_v27 }
 0x822   :  { %s1336_s20 = spop %1335 }
 0x823   :  { %v1056_v28 = vstv %s1336_s20 }
 0x824   :  { %v1058_v29 = vmul.f32 0.015873017, %v1056_v28 }
 0x826   :  { %1363 = vrsqrt.f32 %v1058_v29  ;;  %vm1061_vm9 = vcmp.eq.f32.partialorder %v1058_v29, inf  ;;  %v1064_v31 = vand.u32 2147483648, %v1058_v29  ;;  %vm1063_vm10 = vcmp.eq.f32.partialorder %v1058_v29, 0.0 }
 0x833   :  { %v1364_v22 = vpop.eup %1363 }
 0x834   :  { %v1060_v30 = vmul.f32 %v1364_v22, %v1058_v29 }
 0x836   :  { %v1062_v32 = vsel %vm1061_vm9, %v1058_v29, %v1060_v30 }
 0x837   :  { %v1065_v33 = vsel %vm1063_vm10, %v1064_v31, %v1062_v32 }
 0x838   :  { %1365 = vrcp.f32 %v1065_v33 }
 0x845   :  { %v1366_v34 = vpop.eup %1365 }
 0x846   :  { %v1067_v13 = vmul.f32 %v1366_v34, %v1044_v11 }
 0x848   :  { %1331 = vmatmul.mubr.msk.f32.vlgmr.msra.gmra.mxu1 %vm906_vm7, %v1067_v13 }
 0x849   :  { %1378 = shalt.err (!%p1375_p4)
}
 0x84a   :  { %s1419_s2 = smov 128   ;;  %v1072_v35 = vld [vmem:[%s1648_s5] sm:$0x3]  ;;  %s1420_s27 = smov [#allocation2]   ;;  %vm1146_vm11 = vcmask 9216  }
 0x84b   :  { %1169 = dma.vmem_to_hbm [thread:$0]  %s1164_s21, 256, %s1650_s7, [#allocation5], %s1419_s2, %s1419_s2, %s1417_s3  }
 0x84c   :  { %s1154_s28 = sshll.u32 %s1420_s27, 4  ;;  %s1155_s28 = int_to_ptr.vmem [resolvable:$true] %s1154_s28 }
 0x84d   :  { %s1387_s29 = scalar_lea.vmem %s1155_s28, 32  ;;  %p1392_p6 = scmp.lt.s32.totalorder %s1155_s28, %s1155_s28 }
 0x84e   :  { %p1388_p5 = scmp.ne.s32.totalorder %s1155_s28, %s1387_s29  ;;  %p1393_p7 = scmp.lt.s32.totalorder %s1387_s29, %s1387_s29 }
 0x850   :  { %p1394_p8 = por %p1393_p7, %p1392_p6 }
 0x852   :  { %p1395_p9 = pnand %p1394_p8, %p1388_p5 }
 0x908   :  { %v1142_v36 = vpop.f32.mrf.mxu1 }
 0x909   :  { %v1143_v37 = vadd.f32 %v1142_v36, %v1072_v35 }
 0x90a   :  { %v1332_v38 = vpop.f32.mrf.mxu1 }
 0x90b   :  { %1147 = vst.msk [vmem:[#allocation2] sm:$0x3] %vm1146_vm11, %v1143_v37 }
 0x90c   :  { %1398 = shalt.err (!%p1395_p9)
}
 0x90d   :  { %1157 = dma.vmem_to_hbm [thread:$0]  %s1155_s28, 32, %s1649_s6, [#allocation3]  }
 0x90e   :  { %1407 = dma.done.wait [#allocation3], 32  }
 0x90f   :  { %1408 = vsyncadd [#allocation3], 4294967264 }
 0x910   :  { %1409 = dma.done.wait [#allocation5], 256  }
 0x911   :  { %1410 = vsyncadd [#allocation5], 4294967040 }
 0x912   :  { %1176 = vsyncpa [#allocation3], 1 }
 0x913   :  { %1177 = vsyncpa [#allocation5], 1 }

</bundles_post_ra>
